<compile_context>
chip_gen: v5e
topology: v5e:2x2
jax: 0.10.0
libtpu: 0.0.40
codegen_flags: <defaults>
</compile_context>

<pallas_src>
import functools
import math

import jax
import jax.numpy as jnp
from jax import lax
from jax.experimental import pallas as pl
from jax.experimental.pallas import tpu as pltpu

_LANES = 128
_TM_MAX = 2048  # row-tile size (multiple of 8); 1 MiB f32 per input block


def _imse_kernel(yt_ref, ye_ref, mt_ref, me_ref, out_ref,
                 acc_mm, acc_m, acc_te, acc_ee,
                 *, alpha, beta, valid_rows, needs_mask, tm, acc_rows):
    t = pl.program_id(1)
    num_t = pl.num_programs(1)

    @pl.when(t == 0)
    def _():
        acc_mm[...] = jnp.zeros_like(acc_mm)
        acc_m[...] = jnp.zeros_like(acc_m)
        acc_te[...] = jnp.zeros_like(acc_te)
        acc_ee[...] = jnp.zeros_like(acc_ee)

    yt = yt_ref[0].astype(jnp.float32)
    ye = ye_ref[0].astype(jnp.float32)
    mt = mt_ref[0].astype(jnp.float32)
    me = me_ref[0].astype(jnp.float32)

    y_err = (yt - ye) ** 2

    if needs_mask:
        # Only emitted when P % TM != 0: the final row tile reads past the end
        # of the slab (unspecified values) and must be zeroed.  Masking the two
        # mask planes AND y_err guarantees no NaN/Inf leaks via 0 * garbage.
        row = lax.broadcasted_iota(jnp.int32, (tm, _LANES), 0)
        keep = jnp.logical_or(t != num_t - 1, row < valid_rows)
        mt = jnp.where(keep, mt, 0.0)
        me = jnp.where(keep, me, 0.0)
        y_err = jnp.where(keep, y_err, 0.0)

    def _fold(x):
        # Fold sublane groups with vreg adds (VPU only) into an (8,128) slab.
        if acc_rows != tm:  # tm is a multiple of 8 and > 8 on this path
            return x.reshape(tm // 8, 8, _LANES).sum(axis=0)
        return x

    acc_mm[...] += _fold(mt * me)
    acc_m[...] += _fold(mt)
    acc_te[...] += _fold(mt * y_err)
    acc_ee[...] += _fold(me * y_err)

    @pl.when(t == num_t - 1)
    def _():
        s_mm = jnp.sum(acc_mm[...])
        s_m = jnp.sum(acc_m[...])
        s_te = jnp.sum(acc_te[...])
        s_ee = jnp.sum(acc_ee[...])
        weight = jnp.exp(beta * (s_mm / (s_m + 1e-10) - 1.0))
        aw = alpha * weight
        # (1-aw)*s_te + aw*s_ee  ==  s_te + aw*(s_ee - s_te)
        contrib = (s_te + aw * (s_ee - s_te)) / (s_m + 1.0)
        out_ref[...] = jnp.full(out_ref.shape, contrib, dtype=out_ref.dtype)


def _to_slab(x, b, n, p):
    """Flatten trailing dims and lane-pad (zeros) to [B, P, 128]."""
    flat = x.reshape(b, n)
    pad = p * _LANES - n
    if pad:  # only when H*W is not a multiple of 128
        flat = jnp.pad(flat, ((0, 0), (0, pad)))
    return flat.reshape(b, p, _LANES)


@functools.partial(jax.jit, static_argnames=("alpha", "beta", "tm_max"))
def intersected_mse(y_t, y_est, m_t, m_est, alpha=1.0, beta=30.0,
                    tm_max=_TM_MAX):
    assert y_t.shape == y_est.shape == m_t.shape == m_est.shape
    b = y_t.shape[0]
    n = math.prod(y_t.shape[1:])        # elements summed per batch (dims 1,2)
    p = pl.cdiv(n, _LANES)              # lane-dense rows per batch

    if p <= tm_max:
        tm, t_tiles = p, 1              # whole-batch block (any row count ok)
    else:
        assert tm_max % 8 == 0
        tm, t_tiles = tm_max, pl.cdiv(p, tm_max)
    needs_mask = (p % tm) != 0
    valid_rows = p - (t_tiles - 1) * tm
    acc_rows = 8 if (tm % 8 == 0) else tm   # tiny accumulators when foldable

    slabs = [_to_slab(a, b, n, p) for a in (y_t, y_est, m_t, m_est)]

    kernel = functools.partial(
        _imse_kernel,
        alpha=float(alpha), beta=float(beta),
        valid_rows=valid_rows, needs_mask=needs_mask,
        tm=tm, acc_rows=acc_rows,
    )

    per_batch = pl.pallas_call(
        kernel,
        out_shape=jax.ShapeDtypeStruct((b, 1, _LANES), jnp.float32),
        grid_spec=pltpu.PrefetchScalarGridSpec(
            num_scalar_prefetch=0,
            grid=(b, t_tiles),
            in_specs=[
                pl.BlockSpec((1, tm, _LANES), lambda bi, ti: (bi, ti, 0)),
                pl.BlockSpec((1, tm, _LANES), lambda bi, ti: (bi, ti, 0)),
                pl.BlockSpec((1, tm, _LANES), lambda bi, ti: (bi, ti, 0)),
                pl.BlockSpec((1, tm, _LANES), lambda bi, ti: (bi, ti, 0)),
            ],
            out_specs=pl.BlockSpec((1, 1, _LANES), lambda bi, ti: (bi, 0, 0)),
            scratch_shapes=[pltpu.VMEM((acc_rows, _LANES), jnp.float32)] * 4,
        ),
        compiler_params=pltpu.CompilerParams(
            dimension_semantics=("parallel", "arbitrary"),
        ),
    )(*slabs)

    # Tiny final combine over B per-batch contributions.
    return jnp.sum(per_batch[:, 0, 0])


# Pure-JAX reference (mirrors the PyTorch module exactly).
def _ref(y_t, y_est, m_t, m_est, alpha=1.0, beta=30.0):
    s_m = jnp.sum(m_t, axis=(1, 2))
    s_mm = jnp.sum(m_t * m_est, axis=(1, 2))
    weight = jnp.exp(beta * (s_mm / (s_m + 1e-10) - 1.0))
    y_err = (y_t - y_est) ** 2
    s_te = jnp.sum(m_t * y_err, axis=(1, 2))
    s_ee = jnp.sum(m_est * y_err, axis=(1, 2))
    denom = s_m + 1.0
    return (jnp.sum((1.0 - alpha * weight) * s_te / denom)
            + jnp.sum(alpha * weight * s_ee / denom))


def _make_inputs(key, shape):
    k1, k2, k3, k4 = jax.random.split(key, 4)
    y_t = jax.random.normal(k1, shape, dtype=jnp.float32)
    y_est = jax.random.normal(k2, shape, dtype=jnp.float32)
    m_t = (jax.random.uniform(k3, shape) > 0.4).astype(jnp.float32)
    # Mostly-overlapping estimate mask so both loss terms carry weight.
    m_est = jnp.where(jax.random.uniform(k4, shape) > 0.15, m_t, 1.0 - m_t)
    return y_t, y_est, m_t, m_est


if __name__ == "__main__":
    key = jax.random.PRNGKey(0)

    # (shape, tm_max) cases covering: tiny whole-batch tile, fold-to-(8,128)
    # path, multi-tile + ragged-tail mask path, and lane-padding path.
    cases = [
        ((2, 16, 16), _TM_MAX),   # p=2,  single tile, small-acc fallback
        ((2, 64, 48), _TM_MAX),   # p=24, single tile, folded (8,128) acc
        ((2, 40, 32), 8),         # p=10, 2 tiles, masked ragged tail
        ((2, 10, 10), _TM_MAX),   # n=100, lane padding to 128
    ]
    for shape, tm_max in cases:
        key, sub = jax.random.split(key)
        ins = _make_inputs(sub, shape)
        got = jax.block_until_ready(intersected_mse(*ins, tm_max=tm_max))
        want = _ref(*ins)
        assert jnp.allclose(got, want, rtol=2e-4, atol=1e-5), (shape, got, want)

    print("KERNEL_OK")
</pallas_src>

<mosaic_0001>
module attributes {stable_mosaic.version = 11 : i64} {
  func.func @_imse_kernel(%arg0: i32, %arg1: i32, %arg2: memref<1x2x128xf32, #tpu.memory_space<vmem>>, %arg3: memref<1x2x128xf32, #tpu.memory_space<vmem>>, %arg4: memref<1x2x128xf32, #tpu.memory_space<vmem>>, %arg5: memref<1x2x128xf32, #tpu.memory_space<vmem>>, %arg6: memref<1x1x128xf32, #tpu.memory_space<vmem>>, %arg7: memref<2x128xf32, #tpu.memory_space<vmem>>, %arg8: memref<2x128xf32, #tpu.memory_space<vmem>>, %arg9: memref<2x128xf32, #tpu.memory_space<vmem>>, %arg10: memref<2x128xf32, #tpu.memory_space<vmem>>) attributes {dimension_semantics = [#tpu.dimension_semantics<parallel>, #tpu.dimension_semantics<arbitrary>], iteration_bounds = array<i64: 2, 1>, scalar_prefetch = 0 : i64, scratch_operands = 4 : i64, tpu.core_type = #tpu.core_type<tc>, window_params = [{transform_indices = @transform_0, window_bounds = array<i64: 1, 2, 128>}, {transform_indices = @transform_1, window_bounds = array<i64: 1, 2, 128>}, {transform_indices = @transform_2, window_bounds = array<i64: 1, 2, 128>}, {transform_indices = @transform_3, window_bounds = array<i64: 1, 2, 128>}, {transform_indices = @transform_4, window_bounds = array<i64: 1, 1, 128>}]} {
    %c0_i32 = arith.constant 0 : i32
    %0 = arith.cmpi eq, %arg1, %c0_i32 : i32
    %1 = arith.extui %0 : i1 to i32
    %c0_i32_0 = arith.constant 0 : i32
    %2 = arith.cmpi ne, %1, %c0_i32_0 : i32
    scf.if %2 {
      %cst = arith.constant 0.000000e+00 : f32
      %31 = vector.broadcast %cst : f32 to vector<2x128xf32>
      %c0_30 = arith.constant 0 : index
      %c0_31 = arith.constant 0 : index
      %32 = vector.load %arg7[%c0_30, %c0_31] : memref<2x128xf32, #tpu.memory_space<vmem>>, vector<2x128xf32>
      tpu.vector_store %arg7[%c0_30, %c0_31], %31 {strides = array<i32>} : memref<2x128xf32, #tpu.memory_space<vmem>>, vector<2x128xf32>,
      %cst_32 = arith.constant 0.000000e+00 : f32
      %33 = vector.broadcast %cst_32 : f32 to vector<2x128xf32>
      %c0_33 = arith.constant 0 : index
      %c0_34 = arith.constant 0 : index
      %34 = vector.load %arg8[%c0_33, %c0_34] : memref<2x128xf32, #tpu.memory_space<vmem>>, vector<2x128xf32>
      tpu.vector_store %arg8[%c0_33, %c0_34], %33 {strides = array<i32>} : memref<2x128xf32, #tpu.memory_space<vmem>>, vector<2x128xf32>,
      %cst_35 = arith.constant 0.000000e+00 : f32
      %35 = vector.broadcast %cst_35 : f32 to vector<2x128xf32>
      %c0_36 = arith.constant 0 : index
      %c0_37 = arith.constant 0 : index
      %36 = vector.load %arg9[%c0_36, %c0_37] : memref<2x128xf32, #tpu.memory_space<vmem>>, vector<2x128xf32>
      tpu.vector_store %arg9[%c0_36, %c0_37], %35 {strides = array<i32>} : memref<2x128xf32, #tpu.memory_space<vmem>>, vector<2x128xf32>,
      %cst_38 = arith.constant 0.000000e+00 : f32
      %37 = vector.broadcast %cst_38 : f32 to vector<2x128xf32>
      %c0_39 = arith.constant 0 : index
      %c0_40 = arith.constant 0 : index
      %38 = vector.load %arg10[%c0_39, %c0_40] : memref<2x128xf32, #tpu.memory_space<vmem>>, vector<2x128xf32>
      tpu.vector_store %arg10[%c0_39, %c0_40], %37 {strides = array<i32>} : memref<2x128xf32, #tpu.memory_space<vmem>>, vector<2x128xf32>,
    } else {
    }
    %c0 = arith.constant 0 : index
    %c0_1 = arith.constant 0 : index
    %c0_2 = arith.constant 0 : index
    %3 = vector.load %arg2[%c0, %c0_1, %c0_2] : memref<1x2x128xf32, #tpu.memory_space<vmem>>, vector<1x2x128xf32>
    %4 = vector.shape_cast %3 : vector<1x2x128xf32> to vector<2x128xf32>
    %c0_3 = arith.constant 0 : index
    %c0_4 = arith.constant 0 : index
    %c0_5 = arith.constant 0 : index
    %5 = vector.load %arg3[%c0_3, %c0_4, %c0_5] : memref<1x2x128xf32, #tpu.memory_space<vmem>>, vector<1x2x128xf32>
    %6 = vector.shape_cast %5 : vector<1x2x128xf32> to vector<2x128xf32>
    %c0_6 = arith.constant 0 : index
    %c0_7 = arith.constant 0 : index
    %c0_8 = arith.constant 0 : index
    %7 = vector.load %arg4[%c0_6, %c0_7, %c0_8] : memref<1x2x128xf32, #tpu.memory_space<vmem>>, vector<1x2x128xf32>
    %8 = vector.shape_cast %7 : vector<1x2x128xf32> to vector<2x128xf32>
    %c0_9 = arith.constant 0 : index
    %c0_10 = arith.constant 0 : index
    %c0_11 = arith.constant 0 : index
    %9 = vector.load %arg5[%c0_9, %c0_10, %c0_11] : memref<1x2x128xf32, #tpu.memory_space<vmem>>, vector<1x2x128xf32>
    %10 = vector.shape_cast %9 : vector<1x2x128xf32> to vector<2x128xf32>
    %11 = arith.subf %4, %6 : vector<2x128xf32>
    %12 = arith.mulf %11, %11 : vector<2x128xf32>
    %c0_12 = arith.constant 0 : index
    %c0_13 = arith.constant 0 : index
    %13 = vector.load %arg7[%c0_12, %c0_13] : memref<2x128xf32, #tpu.memory_space<vmem>>, vector<2x128xf32>
    %14 = arith.mulf %8, %10 : vector<2x128xf32>
    %15 = arith.addf %13, %14 : vector<2x128xf32>
    %c0_14 = arith.constant 0 : index
    %c0_15 = arith.constant 0 : index
    %16 = vector.load %arg7[%c0_14, %c0_15] : memref<2x128xf32, #tpu.memory_space<vmem>>, vector<2x128xf32>
    tpu.vector_store %arg7[%c0_14, %c0_15], %15 {strides = array<i32>} : memref<2x128xf32, #tpu.memory_space<vmem>>, vector<2x128xf32>,
    %c0_16 = arith.constant 0 : index
    %c0_17 = arith.constant 0 : index
    %17 = vector.load %arg8[%c0_16, %c0_17] : memref<2x128xf32, #tpu.memory_space<vmem>>, vector<2x128xf32>
    %18 = arith.addf %17, %8 : vector<2x128xf32>
    %c0_18 = arith.constant 0 : index
    %c0_19 = arith.constant 0 : index
    %19 = vector.load %arg8[%c0_18, %c0_19] : memref<2x128xf32, #tpu.memory_space<vmem>>, vector<2x128xf32>
    tpu.vector_store %arg8[%c0_18, %c0_19], %18 {strides = array<i32>} : memref<2x128xf32, #tpu.memory_space<vmem>>, vector<2x128xf32>,
    %c0_20 = arith.constant 0 : index
    %c0_21 = arith.constant 0 : index
    %20 = vector.load %arg9[%c0_20, %c0_21] : memref<2x128xf32, #tpu.memory_space<vmem>>, vector<2x128xf32>
    %21 = arith.mulf %8, %12 : vector<2x128xf32>
    %22 = arith.addf %20, %21 : vector<2x128xf32>
    %c0_22 = arith.constant 0 : index
    %c0_23 = arith.constant 0 : index
    %23 = vector.load %arg9[%c0_22, %c0_23] : memref<2x128xf32, #tpu.memory_space<vmem>>, vector<2x128xf32>
    tpu.vector_store %arg9[%c0_22, %c0_23], %22 {strides = array<i32>} : memref<2x128xf32, #tpu.memory_space<vmem>>, vector<2x128xf32>,
    %c0_24 = arith.constant 0 : index
    %c0_25 = arith.constant 0 : index
    %24 = vector.load %arg10[%c0_24, %c0_25] : memref<2x128xf32, #tpu.memory_space<vmem>>, vector<2x128xf32>
    %25 = arith.mulf %10, %12 : vector<2x128xf32>
    %26 = arith.addf %24, %25 : vector<2x128xf32>
    %c0_26 = arith.constant 0 : index
    %c0_27 = arith.constant 0 : index
    %27 = vector.load %arg10[%c0_26, %c0_27] : memref<2x128xf32, #tpu.memory_space<vmem>>, vector<2x128xf32>
    tpu.vector_store %arg10[%c0_26, %c0_27], %26 {strides = array<i32>} : memref<2x128xf32, #tpu.memory_space<vmem>>, vector<2x128xf32>,
    %c0_i32_28 = arith.constant 0 : i32
    %28 = arith.cmpi eq, %arg1, %c0_i32_28 : i32
    %29 = arith.extui %28 : i1 to i32
    %c0_i32_29 = arith.constant 0 : i32
    %30 = arith.cmpi ne, %29, %c0_i32_29 : i32
    scf.if %30 {
      %c0_30 = arith.constant 0 : index
      %c0_31 = arith.constant 0 : index
      %31 = vector.load %arg7[%c0_30, %c0_31] : memref<2x128xf32, #tpu.memory_space<vmem>>, vector<2x128xf32>
      %32 = vector.shape_cast %31 : vector<2x128xf32> to vector<1x2x128xf32>
      %cst = arith.constant dense<0.000000e+00> : vector<1xf32>
      %33 = vector.multi_reduction <add>, %32, %cst [1, 2] : vector<1x2x128xf32> to vector<1xf32>
      %34 = vector.shape_cast %33 : vector<1xf32> to vector<1x1x1xf32>
      %35 = vector.extract %34[0, 0, 0] : f32 from vector<1x1x1xf32>
      %c0_32 = arith.constant 0 : index
      %c0_33 = arith.constant 0 : index
      %36 = vector.load %arg8[%c0_32, %c0_33] : memref<2x128xf32, #tpu.memory_space<vmem>>, vector<2x128xf32>
      %37 = vector.shape_cast %36 : vector<2x128xf32> to vector<1x2x128xf32>
      %cst_34 = arith.constant dense<0.000000e+00> : vector<1xf32>
      %38 = vector.multi_reduction <add>, %37, %cst_34 [1, 2] : vector<1x2x128xf32> to vector<1xf32>
      %39 = vector.shape_cast %38 : vector<1xf32> to vector<1x1x1xf32>
      %40 = vector.extract %39[0, 0, 0] : f32 from vector<1x1x1xf32>
      %c0_35 = arith.constant 0 : index
      %c0_36 = arith.constant 0 : index
      %41 = vector.load %arg9[%c0_35, %c0_36] : memref<2x128xf32, #tpu.memory_space<vmem>>, vector<2x128xf32>
      %42 = vector.shape_cast %41 : vector<2x128xf32> to vector<1x2x128xf32>
      %cst_37 = arith.constant dense<0.000000e+00> : vector<1xf32>
      %43 = vector.multi_reduction <add>, %42, %cst_37 [1, 2] : vector<1x2x128xf32> to vector<1xf32>
      %44 = vector.shape_cast %43 : vector<1xf32> to vector<1x1x1xf32>
      %45 = vector.extract %44[0, 0, 0] : f32 from vector<1x1x1xf32>
      %c0_38 = arith.constant 0 : index
      %c0_39 = arith.constant 0 : index
      %46 = vector.load %arg10[%c0_38, %c0_39] : memref<2x128xf32, #tpu.memory_space<vmem>>, vector<2x128xf32>
      %47 = vector.shape_cast %46 : vector<2x128xf32> to vector<1x2x128xf32>
      %cst_40 = arith.constant dense<0.000000e+00> : vector<1xf32>
      %48 = vector.multi_reduction <add>, %47, %cst_40 [1, 2] : vector<1x2x128xf32> to vector<1xf32>
      %49 = vector.shape_cast %48 : vector<1xf32> to vector<1x1x1xf32>
      %50 = vector.extract %49[0, 0, 0] : f32 from vector<1x1x1xf32>
      %cst_41 = arith.constant 1.000000e-10 : f32
      %51 = arith.addf %40, %cst_41 : f32
      %52 = arith.divf %35, %51 : f32
      %cst_42 = arith.constant 1.000000e+00 : f32
      %53 = arith.subf %52, %cst_42 : f32
      %cst_43 = arith.constant 3.000000e+01 : f32
      %54 = arith.mulf %cst_43, %53 : f32
      %55 = math.exp %54 : f32
      %cst_44 = arith.constant 1.000000e+00 : f32
      %56 = arith.mulf %cst_44, %55 : f32
      %57 = arith.subf %50, %45 : f32
      %58 = arith.mulf %56, %57 : f32
      %59 = arith.addf %45, %58 : f32
      %cst_45 = arith.constant 1.000000e+00 : f32
      %60 = arith.addf %40, %cst_45 : f32
      %61 = arith.divf %59, %60 : f32
      %62 = vector.broadcast %61 : f32 to vector<1x1x128xf32>
      %c0_46 = arith.constant 0 : index
      %c0_47 = arith.constant 0 : index
      %c0_48 = arith.constant 0 : index
      %63 = vector.load %arg6[%c0_46, %c0_47, %c0_48] : memref<1x1x128xf32, #tpu.memory_space<vmem>>, vector<1x1x128xf32>
      tpu.vector_store %arg6[%c0_46, %c0_47, %c0_48], %62 {strides = array<i32>} : memref<1x1x128xf32, #tpu.memory_space<vmem>>, vector<1x1x128xf32>,
    } else {
    }
    return
  }
  func.func @transform_0(%arg0: i32, %arg1: i32) -> (i32, i32, i32) {
    %c0_i32 = arith.constant 0 : i32
    %c0_i32_0 = arith.constant 0 : i32
    return %arg0, %arg1, %c0_i32 : i32, i32, i32
  }
  func.func @transform_1(%arg0: i32, %arg1: i32) -> (i32, i32, i32) {
    %c0_i32 = arith.constant 0 : i32
    %c0_i32_0 = arith.constant 0 : i32
    return %arg0, %arg1, %c0_i32 : i32, i32, i32
  }
  func.func @transform_2(%arg0: i32, %arg1: i32) -> (i32, i32, i32) {
    %c0_i32 = arith.constant 0 : i32
    %c0_i32_0 = arith.constant 0 : i32
    return %arg0, %arg1, %c0_i32 : i32, i32, i32
  }
  func.func @transform_3(%arg0: i32, %arg1: i32) -> (i32, i32, i32) {
    %c0_i32 = arith.constant 0 : i32
    %c0_i32_0 = arith.constant 0 : i32
    return %arg0, %arg1, %c0_i32 : i32, i32, i32
  }
  func.func @transform_4(%arg0: i32, %arg1: i32) -> (i32, i32, i32) {
    %c0_i32 = arith.constant 0 : i32
    %c0_i32_0 = arith.constant 0 : i32
    %c0_i32_1 = arith.constant 0 : i32
    return %arg0, %c0_i32, %c0_i32_0 : i32, i32, i32
  }
}

</mosaic_0001>

<bundles_post_ra>
// kernel: intersected_mse.1
= control target key start
LH: loop header
LB: loop body
LE: loop exit
PB: predicated region body
PF: predicated region fallthrough
CT: control target
= control target key end

     0   :  { %s632_s15 = smov 0   ;;  %s634_s16 = smov 0   ;;  %s685_s0 = inlined_call_operand.vmem [shape: f32[2,2,128], index: 0, kind: input, shape index: {}]   ;;  %s686_s1 = inlined_call_operand.vmem [shape: f32[2,2,128], index: 1, kind: input, shape index: {}]   ;;  %s687_s2 = inlined_call_operand.vmem [shape: f32[2,2,128], index: 2, kind: input, shape index: {}]   ;;  %s688_s3 = inlined_call_operand.vmem [shape: f32[2,2,128], index: 3, kind: input, shape index: {}]   ;;  %s689_s4 = inlined_call_operand.vmem [shape: f32[2,1,128], index: 4, kind: output, shape index: {}]  }
   0x1   :  { %s636_s17 = smov 0  }
   0x2 LB: > { %s26_s18 = sadd.s32 1, %s600_s16  ;;  %p529_p0 = scmp.ge.s32.totalorder %s604_s17, 1  ;;  %s604_s17 = sphi %s636_s17, %s14_s17   ;;  %s600_s16 = sphi %s634_s16, %s691_s16   ;;  %s596_s15 = sphi %s632_s15, %s690_s15  }
   0x3   : > { %p28_p1 = scmp.ge.s32.totalorder %s26_s18, 2  ;;  %p220_p2 = scmp.lt.s32.totalorder %s604_s17, 3 }
   0x5   : > { %s693_s18 = smov (%p28_p1, %s26_s18), 0  ;;  %p221_p3 = pnand %p529_p0, %p220_p2 }
   0x6   : > { %p267_p4 = scmp.lt.s32.totalorder (!%p221_p3), %s596_s15, 1 }
   0x7   : > { %224 = sbr.rel (%p221_p3) target bundleno = 362 (0x16a), region = 36 }
   0xc   : > { %v606_v0 = vmov 0.0   ;;  %s695_s15 = smov (!%p267_p4, %s596_s15), 1  ;;  %vm331_vm0 = vcmask 1041408  }
   0xd   : > { %302 = vst [vmem:[#allocation2] sm:$0x3] %v606_v0  ;;  %s530_s19 = sshll.u32 %s695_s15, 1  ;;  %s297_s27 = scalar_lea.vmem %s689_s4, %s695_s15 }
   0xe   : > { %303 = vst [vmem:[#allocation3] sm:$0x3] %v606_v0  ;;  %s287_s22 = scalar_lea.vmem %s687_s2, %s530_s19  ;;  %s294_s25 = scalar_lea.vmem %s688_s3, %s530_s19 }
   0xf   : > { %304 = vst [vmem:[#allocation4] sm:$0x3] %v606_v0  ;;  %v308_v1 = vld [vmem:[%s287_s22] sm:$0x3]  ;;  %s273_s28 = scalar_lea.vmem %s685_s0, %s530_s19  ;;  %s280_s5 = scalar_lea.vmem %s686_s1, %s530_s19 }
  0x10   : > { %305 = vst [vmem:[#allocation5] sm:$0x3] %v606_v0  ;;  %v309_v2 = vld [vmem:[%s294_s25] sm:$0x3] }
  0x11   : > { %v313_v3 = vmul.f32 %v309_v2, %v308_v1  ;;  %v306_v4 = vld [vmem:[%s273_s28] sm:$0x3] }
  0x12   : > { %v307_v5 = vld [vmem:[%s280_s5] sm:$0x3] }
  0x13   : > { %v310_v7 = vsub.f32 %v306_v4, %v307_v5 }
  0x14   : > { %v312_v6 = vld [vmem:[#allocation2] sm:$0x3] }
  0x15   : > { %v314_v8 = vadd.f32 %v313_v3, %v312_v6  ;;  %v316_v9 = vld [vmem:[#allocation3] sm:$0x3]  ;;  %v311_v11 = vmul.f32 %v310_v7, %v310_v7 }
  0x16   : > { %v317_v10 = vadd.f32 %v316_v9, %v308_v1  ;;  %v319_v12 = vld [vmem:[#allocation4] sm:$0x3] }
  0x17   : > { %315 = vst [vmem:[#allocation2] sm:$0x3] %v314_v8  ;;  %v323_v13 = vld [vmem:[#allocation5] sm:$0x3]  ;;  %v320_v14 = vmul.f32 %v311_v11, %v308_v1  ;;  %v324_v15 = vmul.f32 %v311_v11, %v309_v2 }
  0x18   : > { %318 = vst [vmem:[#allocation3] sm:$0x3] %v317_v10 }
  0x19   : > { %v321_v16 = vadd.f32 %v320_v14, %v319_v12  ;;  %v325_v17 = vadd.f32 %v324_v15, %v323_v13 }
  0x1b   : > { %322 = vst [vmem:[#allocation4] sm:$0x3] %v321_v16 }
  0x1c   : > { %326 = vst [vmem:[#allocation5] sm:$0x3] %v325_v17 }
  0x1e   : > { %v330_v18 = vld [vmem:[#allocation2] sm:$0x3] }
  0x1f   : > { %v332_v19 = vsel %vm331_vm0, %v330_v18, 0.0  ;;  %v342_v20 = vld [vmem:[#allocation3] sm:$0x3] }
  0x20   : > { %333 = vadd.xlane.f32.xlu0 %v332_v19  ;;  %v343_v23 = vsel %vm331_vm0, %v342_v20, 0.0 }
  0x22   : > { %v353_v21 = vld [vmem:[#allocation4] sm:$0x3] }
  0x23   : > { %v354_v22 = vsel %vm331_vm0, %v353_v21, 0.0  ;;  %v364_v24 = vld [vmem:[#allocation5] sm:$0x3] }
  0x24   : > { %355 = vadd.xlane.f32.xlu1 %v354_v22  ;;  %v365_v25 = vsel %vm331_vm0, %v364_v24, 0.0 }
  0x28   : > { %344 = vadd.xlane.f32.xlu0 %v343_v23 }
  0x2c   : > { %366 = vadd.xlane.f32.xlu1 %v365_v25 }
  0x93   : > { %v334_v26 = vpop.xlane.xlu0 %333 }
  0x94   : > { %v335_v27 = vrot.slane %v334_v26, 4 }
  0x96   : > { %v336_v28 = vadd.f32 %v335_v27, %v334_v26 }
  0x97   : > { %v356_v40 = vpop.xlane.xlu1 %355 }
  0x98   : > { %v337_v29 = vrot.slane %v336_v28, 2  ;;  %v357_v41 = vrot.slane %v356_v40, 4 }
  0x9a   : > { %v338_v30 = vadd.f32 %v337_v29, %v336_v28  ;;  %v358_v44 = vadd.f32 %v357_v41, %v356_v40 }
  0x9b   : > { %v345_v31 = vpop.xlane.xlu0 %344 }
  0x9c   : > { %v346_v32 = vrot.slane %v345_v31, 4  ;;  %v339_v33 = vrot.slane %v338_v30, 1  ;;  %v359_v47 = vrot.slane %v358_v44, 2 }
  0x9e   : > { %v347_v34 = vadd.f32 %v346_v32, %v345_v31  ;;  %v340_v35 = vadd.f32 %v339_v33, %v338_v30  ;;  %v360_v49 = vadd.f32 %v359_v47, %v358_v44 }
  0x9f   : > { %v367_v42 = vpop.xlane.xlu1 %366 }
  0xa0   : > { %v348_v36 = vrot.slane %v347_v34, 2  ;;  %537 = vpush %v340_v35  ;;  %v368_v43 = vrot.slane %v367_v42, 4  ;;  %v361_v50 = vrot.slane %v360_v49, 1 }
  0xa2   : > { %v349_v37 = vadd.f32 %v348_v36, %v347_v34  ;;  %v369_v45 = vadd.f32 %v368_v43, %v367_v42  ;;  %v362_v52 = vadd.f32 %v361_v50, %v360_v49 }
  0xa4   : > { %v350_v38 = vrot.slane %v349_v37, 1  ;;  %v370_v46 = vrot.slane %v369_v45, 2 }
  0xa6   : > { %v351_v39 = vadd.f32 %v350_v38, %v349_v37  ;;  %v371_v48 = vadd.f32 %v370_v46, %v369_v45 }
  0xa8   : > { %539 = vpush %v351_v39  ;;  %v372_v51 = vrot.slane %v371_v48, 1 }
  0xa9   : > { %541 = vpush %v362_v52 }
  0xaa   : > { %v373_v53 = vadd.f32 %v372_v51, %v371_v48 }
  0xac   : > { %543 = vpush %v373_v53 }
  0xd1   : > { %s665_s6 = spop %537 }
  0xd9   : > { %s540_s7 = spop %539 }
  0xda   : > { %s375_s8 = sadd.f32 1e-10, %s540_s7  ;;  %s667_s10 = spop %541 }
  0xdb   : > { %s402_s9 = sadd.f32 1.0, %s540_s7 }
  0xdc   : > { %v376_v54 = vstv %s375_s8 }
  0xdd   : > { %576 = vrcp.f32 %v376_v54  ;;  %v388_v58 = vand.u32 2147483648, %v376_v54  ;;  %v386_v60 = vand.u32 2147483647, %v376_v54  ;;  %vm382_vm2 = vweird.f32 %v376_v54  ;;  %s544_s11 = spop %543 }
  0xde   : > { %v403_v1 = vstv %s402_s9  ;;  %s399_s20 = ssub.f32 %s544_s11, %s667_s10 }
  0xdf   : > { %v389_v62 = vor.u32 1.1754944e-38, %v388_v58  ;;  %vm387_vm4 = vcmp.eq.f32.partialorder %v386_v60, 8.507059e+37  ;;  %578 = vrcp.f32 %v403_v1  ;;  %v415_v9 = vand.u32 2147483648, %v403_v1 }
  0xe0   : > { %vm409_vm6 = vweird.f32 %v403_v1  ;;  %v413_v10 = vand.u32 2147483647, %v403_v1 }
  0xe1   : > { %v416_v12 = vor.u32 1.1754944e-38, %v415_v9 }
  0xe2   : > { %vm414_vm8 = vcmp.eq.f32.partialorder %v413_v10, 8.507059e+37 }
  0xe3   : > { %v577_v55 = vpop.eup %576 }
  0xe4   : > { %v378_v56 = vmul.f32 %v577_v55, %v376_v54  ;;  %vm383_vm1 = vweird.f32 %v577_v55 }
  0xe5   : > { %vm384_vm3 = vmor %vm382_vm2, %vm383_vm1  ;;  %v579_v2 = vpop.eup %578 }
  0xe6   : > { %v379_v57 = vsub.f32 1.0, %v378_v56  ;;  %v405_v3 = vmul.f32 %v579_v2, %v403_v1  ;;  %vm410_vm5 = vweird.f32 %v579_v2 }
  0xe7   : > { %vm411_vm7 = vmor %vm409_vm6, %vm410_vm5 }
  0xe8   : > { %v380_v59 = vmul.f32 %v577_v55, %v379_v57  ;;  %v406_v4 = vsub.f32 1.0, %v405_v3 }
  0xea   : > { %v381_v61 = vadd.f32 %v577_v55, %v380_v59  ;;  %v407_v5 = vmul.f32 %v579_v2, %v406_v4 }
  0xec   : > { %v385_v63 = vsel %vm384_vm3, %v577_v55, %v381_v61  ;;  %v408_v8 = vadd.f32 %v579_v2, %v407_v5 }
  0xed   : > { %v390_v0 = vsel %vm387_vm4, %v389_v62, %v385_v63 }
  0xee   : > { %545 = vpush %v390_v0  ;;  %v412_v11 = vsel %vm411_vm7, %v579_v2, %v408_v8 }
  0xef   : > { %v417_v14 = vsel %vm414_vm8, %v416_v12, %v412_v11 }
 0x11f   : > { %s546_s12 = spop %545 }
 0x120   : > { %s392_s13 = smul.f32 %s546_s12, %s665_s6 }
 0x122   : > { %s534_s14 = sadd.f32 -1.0, %s392_s13 }
 0x124   : > { %s394_s19 = smul.f32 30.0, %s534_s14 }
 0x126   : > { %v395_v6 = vstv %s394_s19 }
 0x127   : > { %v396_v7 = vmul.f32 1.442695, %v395_v6 }
 0x129   : > { %580 = vpow2.f32 %v396_v7 }
 0x12f   : > { %v581_v13 = vpop.eup %580 }
 0x130   : > { %547 = vpush %v581_v13 }
 0x131   : > { %549 = vpush %v417_v14 }
 0x161   : > { %s548_s21 = spop %547 }
 0x162   : > { %s400_s22 = smul.f32 %s548_s21, %s399_s20  ;;  %s550_s24 = spop %549 }
 0x164   : > { %s401_s23 = sadd.f32 %s667_s10, %s400_s22 }
 0x166   : > { %s419_s28 = smul.f32 %s550_s24, %s401_s23 }
 0x168   : > { %v420_v15 = vstv %s419_s28 }
 0x169   : > { %421 = vst [vmem:[%s297_s27] sm:$0x1] %v420_v15 }
 0x16a PF: > { %s14_s17 = sadd.s32 1, %s604_s17   ;;  %s690_s15 = smov %s600_s16 }
 0x16b   : > { %p11_p5 = scmp.ge.s32.totalorder %s14_s17, 4   ;;  %s691_s16 = smov %s693_s18 }
 0x16d   :  { %13 = sbr.rel (!%p11_p5) target bundleno = 2 (0x2), region = 83 }

</bundles_post_ra>
